<compile_context>
chip_gen: v5e
topology: v5e:2x2
jax: 0.10.0
libtpu: 0.0.40
codegen_flags: <defaults>
</compile_context>

<pallas_src>
import functools

import jax
import jax.numpy as jnp
from jax.experimental import pallas as pl
from jax.experimental.pallas import tpu as pltpu

HIDDEN = 64          # self.hidden_state in the PyTorch module
TB_MAX = 2048        # default batch tile rows (post VMEM-accounting fix)
_LANE = 128


def _round_up(x, m):
    return (x + m - 1) // m * m


# ---------------------------------------------------------------------------
# Kernel
# ---------------------------------------------------------------------------
def _critic_kernel(x_ref, w1_ref, b1_ref, w2_ref, b2_ref, w3_ref, b3_ref, q_ref):
    # ---- layer 1: single K=d_in bf16 matmul on the MXU, f32 accumulate ----
    h1 = jnp.dot(x_ref[...], w1_ref[...], preferred_element_type=jnp.float32)
    h1 = jnp.maximum(h1 + b1_ref[...], 0.0)                      # relu(l1(x))  (f32)

    # ---- layer 2: bf16 MXU feed, f32 accumulate ----
    h2 = jnp.dot(h1.astype(jnp.bfloat16), w2_ref[...],
                 preferred_element_type=jnp.float32)
    h2 = jnp.maximum(h2 + b2_ref[...], 0.0)                      # relu(l2(h1)) (f32)

    # ---- layer 3: (1, H) x (tb, H)^T -> (1, tb) lane-dense row ----
    # Contracting both operands on their last dim (the q @ k.T pattern); the
    # single LHS row makes this nearly free on the MXU and the result lands
    # directly in lane-major form for an unmasked store.
    q = jax.lax.dot_general(
        w3_ref[...], h2.astype(jnp.bfloat16),
        dimension_numbers=(((1,), (1,)), ((), ())),
        preferred_element_type=jnp.float32)                      # (1, tb)
    q_ref[...] = (q + b3_ref[...]).reshape(q_ref.shape).astype(q_ref.dtype)


# ---------------------------------------------------------------------------
# Tiling / VMEM helpers
# ---------------------------------------------------------------------------
def _pick_tile(batch, block_b):
    """Batch tile: multiple of 8, <= block_b, and >= 2 grid steps if possible
    so the 'parallel' axis actually feeds both v7x TensorCores."""
    b8 = _round_up(batch, 8)
    half = max(8, _round_up((b8 + 1) // 2, 8))
    return min(_round_up(block_b, 8), b8, half)


def _vmem_bytes(tb, d_in, hidden):
    """Scoped-VMEM budget with explicit (8, 128) padding of every buffer."""
    lp = lambda n: _round_up(max(n, 1), _LANE)     # lane (last-dim) padding
    inp = 2 * tb * lp(d_in) * 2                    # double-buffered bf16 x tiles
    outp = 2 * 8 * lp(tb) * 4                      # double-buffered (1,1,tb) f32 rows
    inter = 3 * tb * lp(hidden) * 4                # h1 / h2 / pre-relu f32 temps
    wts = 2 * (_round_up(d_in, 16) * lp(hidden) * 2       # w1 bf16
               + _round_up(hidden, 16) * lp(hidden) * 2   # w2 bf16
               + 2 * 8 * lp(hidden) * 4                    # b1, b2 f32
               + 8 * lp(hidden) * 2                        # w3 bf16 row
               + 8 * _LANE * 4)                            # b3
    return int((inp + outp + inter + wts) * 3 // 2) + (1 << 20)


# ---------------------------------------------------------------------------
# Wrappers
# ---------------------------------------------------------------------------
@functools.partial(jax.jit, static_argnames=("block_b",))
def critic_forward_packed(x, params, block_b=TB_MAX):
    """Forward pass on a pre-packed bf16 input x = cat([state, action, rho], 1)."""
    w1, b1, w2, b2, w3, b3 = params
    B, d_in = x.shape
    hidden = w2.shape[0]
    assert d_in == w1.shape[0]

    x = x.astype(jnp.bfloat16)
    tb = _pick_tile(B, block_b)
    bp = _round_up(B, tb)
    if bp != B:
        x = jnp.pad(x, ((0, bp - B), (0, 0)))
    nb = bp // tb

    # Constant block index -> weights/biases stay VMEM-resident across steps.
    resident = lambda a: pl.BlockSpec(a.shape, lambda i: (0,) * a.ndim)

    flops = 2 * B * (d_in * hidden + hidden * hidden + hidden)
    bytes_accessed = (B * d_in * 2 + B * 4
                      + (d_in * hidden + hidden * hidden + hidden) * 2
                      + (2 * hidden + 1) * 4)

    q = pl.pallas_call(
        _critic_kernel,
        out_shape=jax.ShapeDtypeStruct((nb, 1, tb), jnp.float32),
        grid=(nb,),
        in_specs=[
            pl.BlockSpec((tb, d_in), lambda i: (i, 0)),
            resident(w1), resident(b1),
            resident(w2), resident(b2),
            resident(w3), resident(b3),
        ],
        # Lane-dense row blocks: block == full array on the last two dims.
        out_specs=pl.BlockSpec((1, 1, tb), lambda i: (i, 0, 0)),
        compiler_params=pltpu.CompilerParams(
            dimension_semantics=("parallel",),
            vmem_limit_bytes=_vmem_bytes(tb, d_in, hidden),
        ),
        cost_estimate=pl.CostEstimate(
            flops=flops, transcendentals=0, bytes_accessed=bytes_accessed),
    )(x, w1, b1, w2, b2, w3, b3)

    # (nb, 1, tb) row blocks are already in batch order; reshape + trim padding.
    return q.reshape(bp, 1)[:B]


@functools.partial(jax.jit, static_argnames=("block_b",))
def critic_forward(state, action, rho, params, block_b=TB_MAX):
    """Convenience wrapper mirroring Critic.forward(state, action, rho)."""
    x = jnp.concatenate([state, action, rho], axis=1).astype(jnp.bfloat16)
    return critic_forward_packed(x, params, block_b=block_b)


# ---------------------------------------------------------------------------
# Params
# ---------------------------------------------------------------------------
def init_critic_params(key, state_dim, action_dim, rho_dim, hidden=HIDDEN):
    """Deterministic f32 init matching nn.Linear's U(-1/sqrt(fan_in), +)."""
    d_in = state_dim + action_dim + rho_dim
    keys = jax.random.split(key, 6)

    def lin(kw, kb, fan_in, fan_out):
        bound = 1.0 / jnp.sqrt(float(fan_in))
        w = jax.random.uniform(kw, (fan_in, fan_out), jnp.float32, -bound, bound)
        b = jax.random.uniform(kb, (fan_out,), jnp.float32, -bound, bound)
        return w, b

    w1, b1 = lin(keys[0], keys[1], d_in, hidden)
    w2, b2 = lin(keys[2], keys[3], hidden, hidden)
    w3, b3 = lin(keys[4], keys[5], hidden, 1)
    return (w1, b1, w2, b2, w3, b3)


def pack_critic_params(params):
    """f32 (w1,b1,w2,b2,w3,b3) -> kernel-ready mixed-precision param tuple."""
    w1, b1, w2, b2, w3, b3 = params
    return (w1.astype(jnp.bfloat16),
            b1.reshape(1, -1).astype(jnp.float32),
            w2.astype(jnp.bfloat16),
            b2.reshape(1, -1).astype(jnp.float32),
            w3.reshape(1, -1).astype(jnp.bfloat16),   # (1, H) row, bf16 MXU feed
            b3.reshape(1, 1).astype(jnp.float32))


def critic_reference(state, action, rho, packed):
    """Pure-JAX reference mirroring the kernel's mixed precision."""
    w1, b1, w2, b2, w3, b3 = packed
    f32 = lambda t: t.astype(jnp.float32)
    x = jnp.concatenate([state, action, rho], axis=1).astype(jnp.bfloat16)
    h1 = jnp.maximum(f32(x) @ f32(w1) + b1, 0.0)
    h2 = jnp.maximum(f32(h1.astype(jnp.bfloat16)) @ f32(w2) + b2, 0.0)
    h2b = f32(h2.astype(jnp.bfloat16))
    return jnp.sum(h2b * f32(w3), axis=-1, keepdims=True) + b3


# ---------------------------------------------------------------------------
# Self-test
# ---------------------------------------------------------------------------
if __name__ == "__main__":
    key = jax.random.PRNGKey(0)
    k_param, k_s, k_a, k_r = jax.random.split(key, 4)

    state_dim, action_dim, rho_dim = 8, 4, 4
    raw = init_critic_params(k_param, state_dim, action_dim, rho_dim)
    params = pack_critic_params(raw)

    # --- tiny batch (module spec sanity check, single grid step) ---
    batch = 2
    state = jax.random.normal(k_s, (batch, state_dim), jnp.float32)
    action = jax.random.normal(k_a, (batch, action_dim), jnp.float32)
    rho = jax.random.normal(k_r, (batch, rho_dim), jnp.float32)

    q = jax.block_until_ready(critic_forward(state, action, rho, params))
    q_ref = critic_reference(state, action, rho, params)
    assert q.shape == (batch, 1), q.shape
    assert jnp.allclose(q, q_ref, atol=5e-4, rtol=5e-4), (q, q_ref)

    # --- multi-tile grid + padding + megacore split (default tile -> 2 steps) ---
    batch2 = 300
    k_s2, k_a2, k_r2 = jax.random.split(jax.random.PRNGKey(1), 3)
    state2 = jax.random.normal(k_s2, (batch2, state_dim), jnp.float32)
    action2 = jax.random.normal(k_a2, (batch2, action_dim), jnp.float32)
    rho2 = jax.random.normal(k_r2, (batch2, rho_dim), jnp.float32)

    q2 = jax.block_until_ready(critic_forward(state2, action2, rho2, params))
    q2_ref = critic_reference(state2, action2, rho2, params)
    assert q2.shape == (batch2, 1), q2.shape
    assert jnp.allclose(q2, q2_ref, atol=5e-4, rtol=5e-4)

    # --- explicit small tile (3 grid steps) + pre-packed input entry point ---
    x2 = jnp.concatenate([state2, action2, rho2], axis=1).astype(jnp.bfloat16)
    q3 = jax.block_until_ready(critic_forward_packed(x2, params, block_b=128))
    assert q3.shape == (batch2, 1), q3.shape
    assert jnp.allclose(q3, q2_ref, atol=5e-4, rtol=5e-4)

    print("KERNEL_OK")
</pallas_src>

<mosaic_0001>
module attributes {stable_mosaic.version = 11 : i64} {
  func.func @_critic_kernel(%arg0: i32, %arg1: memref<8x16xbf16, #tpu.memory_space<vmem>>, %arg2: memref<16x64xbf16, #tpu.memory_space<vmem>>, %arg3: memref<1x64xf32, #tpu.memory_space<vmem>>, %arg4: memref<64x64xbf16, #tpu.memory_space<vmem>>, %arg5: memref<1x64xf32, #tpu.memory_space<vmem>>, %arg6: memref<1x64xbf16, #tpu.memory_space<vmem>>, %arg7: memref<1x1xf32, #tpu.memory_space<vmem>>, %arg8: memref<1x1x8xf32, #tpu.memory_space<vmem>>) attributes {dimension_semantics = [#tpu.dimension_semantics<parallel>], iteration_bounds = array<i64: 1>, scalar_prefetch = 0 : i64, scratch_operands = 0 : i64, tpu.core_type = #tpu.core_type<tc>, window_params = [{transform_indices = @transform_0, window_bounds = array<i64: 8, 16>}, {pipeline_mode = #tpu.pipeline_mode<synchronous>, transform_indices = @transform_1, window_bounds = array<i64: 16, 64>}, {pipeline_mode = #tpu.pipeline_mode<synchronous>, transform_indices = @transform_2, window_bounds = array<i64: 1, 64>}, {pipeline_mode = #tpu.pipeline_mode<synchronous>, transform_indices = @transform_3, window_bounds = array<i64: 64, 64>}, {pipeline_mode = #tpu.pipeline_mode<synchronous>, transform_indices = @transform_4, window_bounds = array<i64: 1, 64>}, {pipeline_mode = #tpu.pipeline_mode<synchronous>, transform_indices = @transform_5, window_bounds = array<i64: 1, 64>}, {pipeline_mode = #tpu.pipeline_mode<synchronous>, transform_indices = @transform_6, window_bounds = array<i64: 1, 1>}, {transform_indices = @transform_7, window_bounds = array<i64: 1, 1, 8>}]} {
    %c0 = arith.constant 0 : index
    %c0_0 = arith.constant 0 : index
    %0 = vector.load %arg1[%c0, %c0_0] : memref<8x16xbf16, #tpu.memory_space<vmem>>, vector<8x16xbf16>
    %c0_1 = arith.constant 0 : index
    %c0_2 = arith.constant 0 : index
    %1 = vector.load %arg2[%c0_1, %c0_2] : memref<16x64xbf16, #tpu.memory_space<vmem>>, vector<16x64xbf16>
    %cst = arith.constant dense<0.000000e+00> : vector<8x64xf32>
    %2 = tpu.matmul %0, %1, %cst {dimension_numbers = #tpu.dot_dimension_numbers<[1], [0], [0], [1], [0, 0, 1, 1], [], []>} : vector<8x16xbf16>, vector<16x64xbf16>, vector<8x64xf32> -> vector<8x64xf32>
    %c0_3 = arith.constant 0 : index
    %c0_4 = arith.constant 0 : index
    %3 = vector.load %arg3[%c0_3, %c0_4] : memref<1x64xf32, #tpu.memory_space<vmem>>, vector<1x64xf32>
    %4 = vector.broadcast %3 : vector<1x64xf32> to vector<8x64xf32>
    %5 = arith.addf %2, %4 : vector<8x64xf32>
    %cst_5 = arith.constant 0.000000e+00 : f32
    %6 = vector.broadcast %cst_5 : f32 to vector<8x64xf32>
    %7 = arith.maximumf %5, %6 : vector<8x64xf32>
    %8 = arith.truncf %7 : vector<8x64xf32> to vector<8x64xbf16>
    %c0_6 = arith.constant 0 : index
    %c0_7 = arith.constant 0 : index
    %9 = vector.load %arg4[%c0_6, %c0_7] : memref<64x64xbf16, #tpu.memory_space<vmem>>, vector<64x64xbf16>
    %cst_8 = arith.constant dense<0.000000e+00> : vector<8x64xf32>
    %10 = tpu.matmul %8, %9, %cst_8 {dimension_numbers = #tpu.dot_dimension_numbers<[1], [0], [0], [1], [0, 0, 1, 1], [], []>} : vector<8x64xbf16>, vector<64x64xbf16>, vector<8x64xf32> -> vector<8x64xf32>
    %c0_9 = arith.constant 0 : index
    %c0_10 = arith.constant 0 : index
    %11 = vector.load %arg5[%c0_9, %c0_10] : memref<1x64xf32, #tpu.memory_space<vmem>>, vector<1x64xf32>
    %12 = vector.broadcast %11 : vector<1x64xf32> to vector<8x64xf32>
    %13 = arith.addf %10, %12 : vector<8x64xf32>
    %cst_11 = arith.constant 0.000000e+00 : f32
    %14 = vector.broadcast %cst_11 : f32 to vector<8x64xf32>
    %15 = arith.maximumf %13, %14 : vector<8x64xf32>
    %c0_12 = arith.constant 0 : index
    %c0_13 = arith.constant 0 : index
    %16 = vector.load %arg6[%c0_12, %c0_13] : memref<1x64xbf16, #tpu.memory_space<vmem>>, vector<1x64xbf16>
    %17 = arith.truncf %15 : vector<8x64xf32> to vector<8x64xbf16>
    %cst_14 = arith.constant dense<0.000000e+00> : vector<1x8xf32>
    %18 = tpu.matmul %16, %17, %cst_14 {dimension_numbers = #tpu.dot_dimension_numbers<[1], [1], [0], [0], [0, 0, 1, 0], [], []>} : vector<1x64xbf16>, vector<8x64xbf16>, vector<1x8xf32> -> vector<1x8xf32>
    %c0_15 = arith.constant 0 : index
    %c0_16 = arith.constant 0 : index
    %19 = vector.load %arg7[%c0_15, %c0_16] : memref<1x1xf32, #tpu.memory_space<vmem>>, vector<1x1xf32>
    %20 = vector.broadcast %19 : vector<1x1xf32> to vector<1x8xf32>
    %21 = arith.addf %18, %20 : vector<1x8xf32>
    %22 = vector.shape_cast %21 : vector<1x8xf32> to vector<1x1x8xf32>
    %c0_17 = arith.constant 0 : index
    %c0_18 = arith.constant 0 : index
    %c0_19 = arith.constant 0 : index
    %23 = vector.load %arg8[%c0_17, %c0_18, %c0_19] : memref<1x1x8xf32, #tpu.memory_space<vmem>>, vector<1x1x8xf32>
    tpu.vector_store %arg8[%c0_17, %c0_18, %c0_19], %22 {strides = array<i32>} : memref<1x1x8xf32, #tpu.memory_space<vmem>>, vector<1x1x8xf32>,
    return
  }
  func.func @transform_0(%arg0: i32) -> (i32, i32) {
    %c0_i32 = arith.constant 0 : i32
    %c0_i32_0 = arith.constant 0 : i32
    return %arg0, %c0_i32 : i32, i32
  }
  func.func @transform_1(%arg0: i32) -> (i32, i32) {
    %c0_i32 = arith.constant 0 : i32
    %c0_i32_0 = arith.constant 0 : i32
    %c0_i32_1 = arith.constant 0 : i32
    return %c0_i32, %c0_i32_0 : i32, i32
  }
  func.func @transform_2(%arg0: i32) -> (i32, i32) {
    %c0_i32 = arith.constant 0 : i32
    %c0_i32_0 = arith.constant 0 : i32
    %c0_i32_1 = arith.constant 0 : i32
    return %c0_i32, %c0_i32_0 : i32, i32
  }
  func.func @transform_3(%arg0: i32) -> (i32, i32) {
    %c0_i32 = arith.constant 0 : i32
    %c0_i32_0 = arith.constant 0 : i32
    %c0_i32_1 = arith.constant 0 : i32
    return %c0_i32, %c0_i32_0 : i32, i32
  }
  func.func @transform_4(%arg0: i32) -> (i32, i32) {
    %c0_i32 = arith.constant 0 : i32
    %c0_i32_0 = arith.constant 0 : i32
    %c0_i32_1 = arith.constant 0 : i32
    return %c0_i32, %c0_i32_0 : i32, i32
  }
  func.func @transform_5(%arg0: i32) -> (i32, i32) {
    %c0_i32 = arith.constant 0 : i32
    %c0_i32_0 = arith.constant 0 : i32
    %c0_i32_1 = arith.constant 0 : i32
    return %c0_i32, %c0_i32_0 : i32, i32
  }
  func.func @transform_6(%arg0: i32) -> (i32, i32) {
    %c0_i32 = arith.constant 0 : i32
    %c0_i32_0 = arith.constant 0 : i32
    %c0_i32_1 = arith.constant 0 : i32
    return %c0_i32, %c0_i32_0 : i32, i32
  }
  func.func @transform_7(%arg0: i32) -> (i32, i32, i32) {
    %c0_i32 = arith.constant 0 : i32
    %c0_i32_0 = arith.constant 0 : i32
    %c0_i32_1 = arith.constant 0 : i32
    return %arg0, %c0_i32, %c0_i32_0 : i32, i32, i32
  }
}

</mosaic_0001>

<bundles_post_ra>
// kernel: critic_forward_packed.1
= control target key start
LH: loop header
LB: loop body
LE: loop exit
PB: predicated region body
PF: predicated region fallthrough
CT: control target
= control target key end

     0   :  { %s298_s0 = inlined_call_operand.vmem [shape: bf16[8,16], index: 0, kind: input, shape index: {}]   ;;  %s299_s1 = inlined_call_operand.vmem [shape: bf16[16,64], index: 1, kind: input, shape index: {}]   ;;  %s300_s2 = inlined_call_operand.vmem [shape: f32[1,64], index: 2, kind: input, shape index: {}]   ;;  %s301_s3 = inlined_call_operand.hbm [shape: bf16[64,64], index: 3, kind: input, shape index: {}]   ;;  %s302_s4 = inlined_call_operand.vmem [shape: f32[1,64], index: 4, kind: input, shape index: {}]   ;;  %s303_s5 = inlined_call_operand.vmem [shape: bf16[1,64], index: 5, kind: input, shape index: {}]   ;;  %s304_s6 = inlined_call_operand.<no memory space> [shape: f32[1,1], index: 6, kind: input, shape index: {}]   ;;  %s305_s7 = inlined_call_operand.vmem [shape: f32[1,1,8], index: 7, kind: output, shape index: {}]  }
   0x1   :  { %v12_v0 = vstv %s304_s6 }
   0x2   :  { %13 = vst [vmem:[#allocation2] sm:$0x1] %v12_v0 }
   0x3   :  { %14 = vsyncpa [#allocation4], 0  ;;  %s25_s28 = sshll.u32 %s301_s3, 4  ;;  %s227_s29 = smov [#allocation3]   ;;  %s26_s28 = int_to_ptr.hbm [resolvable:$true] %s25_s28 }
   0x4   :  { %s27_s30 = sshll.u32 %s227_s29, 4  ;;  %s228_s8 = smov 64   ;;  %s28_s30 = int_to_ptr.vmem [resolvable:$true] %s27_s30 }
   0x5   :  { %s229_s9 = smov 4  }
   0x6   :  { %33 = dma.hbm_to_vmem [thread:$0]  %s26_s28, 512, %s28_s30, [#allocation4], %s228_s8, %s228_s8, %s229_s9  }
   0x7   :  { %225 = dma.done.wait [#allocation4], 512  }
   0x8   :  { %226 = vsyncadd [#allocation4], 4294966784  ;;  %v189_v1 = vld [vmem:[%s299_s1] sm:$0xff]  ;;  %vm58_vm0 = vcmask 130048   ;;  %v192_v4 = vld [vmem:[#allocation3 + $0x10] sm:$0xff]  ;;  %vm113_vm1 = vcmask 523264  }
   0x9   :  { %v193_v2 = vld [vmem:[#allocation3 + $0x18] sm:$0xff]  ;;  %69 = vmatpush.bf16.msra.mxu0 %v189_v1  ;;  %v191_v5 = vld [vmem:[#allocation3 + $0x8] sm:$0xff]  ;;  %v190_v6 = vld [vmem:[#allocation3] sm:$0xff]  ;;  %v230_v14 = vmov 0   ;;  %vm159_vm2 = vcmask 57344  }
   0xa   :  { %v45_v3 = vld [vmem:[%s298_s0] sm:$0xf]  ;;  %121 = vmatpush.bf16.msra.mxu1 %v193_v2  ;;  %198 = vset.pattern.permute.xlu0 %v230_v14 }
   0xb   :  { %v199_v7 = vld [vmem:[%s300_s2] ss:$0 sm:$0xff] }
   0xc   :  { %170 = vmatmul.msk.bf16.vlgmr.msra.gmra.mxu0 %vm58_vm0, %v45_v3  ;;  %v133_v13 = vld [vmem:[#allocation2] sm:$0x1] }
   0xd   :  { %136 = vperm.xlu0 %198, %v133_v13   ;;  %v200_v15 = vld [vmem:[%s302_s4] ss:$0 sm:$0xff] }
   0xe   :  { %122 = vmatpush.bf16.msra.mxu1 %v192_v4  ;;  %v131_v22 = vld [vmem:[%s303_s5] sm:$0x1] }
  0x12   :  { %123 = vmatpush.bf16.msra.mxu1 %v191_v5 }
  0x16   :  { %124 = vmatpush.bf16.msra.mxu1 %v190_v6 }
  0x7f   :  { %v137_v23 = vpop.permute.xlu0 %136 }
  0x80   :  { %v139_v24 = vperm.slane %v137_v23, 0 }
  0x89   :  { %v71_v8 = vpop.f32.mrf.mxu0 }
  0x8a   :  { %v72_v9 = vadd.f32 %v199_v7, %v71_v8 }
  0x8c   :  { %v75_v10 = vmax.f32 %v72_v9, 0.0 }
  0x8e   :  { %v76_v11 = vpack.c.bf16 %v75_v10, %v75_v10 }
  0x90   :  { %187 = vmatmul.msk.bf16.vlgmr.msra.gmra.mxu1 %vm113_vm1, %v76_v11 }
  0x91   :  { %v73_v12 = vpop.f32.mrf.mxu0 }
 0x10d   :  { %v126_v16 = vpop.f32.mrf.mxu1 }
 0x10e   :  { %v127_v17 = vadd.f32 %v200_v15, %v126_v16 }
 0x110   :  { %v130_v18 = vmax.f32 %v127_v17, 0.0 }
 0x112   :  { %v132_v19 = vpack.c.bf16 %v130_v18, %v130_v18 }
 0x114   :  { %v144_v20 = vsel %vm113_vm1, %v132_v19, 0 }
 0x115   :  { %v128_v21 = vpop.f32.mrf.mxu1  ;;  %153 = vmatpush.bf16.xpose.msra.mxu2 %v144_v20 }
 0x11c   :  { %188 = vmatmul.msk.bf16.vlgmr.msra.gmra.mxu2 %vm113_vm1, %v131_v22 }
 0x19f   :  { %v155_v25 = vpop.f32.mrf.mxu2 }
 0x1a0   :  { %v156_v26 = vadd.f32 %v155_v25, %v139_v24 }
 0x1a2   :  { %160 = vst.msk [vmem:[%s305_s7] sm:$0x1] %vm159_vm2, %v156_v26 }
 0x1a7   :  { %v157_v27 = vpop.f32.mrf.mxu2 }
 0x1a8   :  { %165 = vsyncpa [#allocation4], 1 }

</bundles_post_ra>
